<compile_context>
chip_gen: v7x
topology: tpu7x:2x2x1
jax: 0.10.0
libtpu: 0.0.40
codegen_flags: <defaults>
</compile_context>

<pallas_src>
import functools

import jax
import jax.numpy as jnp
from jax import lax
from jax.experimental import pallas as pl
from jax.experimental.pallas import tpu as pltpu


def _conv_ln_silu_kernel(x_ref, w_ref, b_ref, g_ref, beta_ref, o_ref,
                         *, k: int, l_out: int, eps: float):
    """One batch element per grid step.

    x_ref:    (1, Cin, L_pad)  zero-padded input (channels=sublanes, length=lanes)
    w_ref:    (k, Cout, Cin)   conv weight, tap-major
    b_ref:    (Cout, 1)        conv bias
    g_ref:    (Cout, 1)        LayerNorm weight (gamma)
    beta_ref: (Cout, 1)        LayerNorm bias  (beta)
    o_ref:    (1, Cout, L_out) output block
    """
    x = x_ref[0]  # (Cin, L_pad)

    # Conv1d (cross-correlation, matches PyTorch) as k shifted MXU matmuls.
    acc = jnp.dot(w_ref[0], x[:, 0:l_out], preferred_element_type=jnp.float32)
    for dk in range(1, k):  # k is small and static -> unrolled
        acc = acc + jnp.dot(w_ref[dk], x[:, dk:dk + l_out],
                            preferred_element_type=jnp.float32)
    acc = acc + b_ref[...]                       # (Cout, L_out) + (Cout, 1)

    # LayerNorm over the channel axis (axis 0 = sublanes), biased variance,
    # same as nn.LayerNorm(out_ch) applied after permute(0, 2, 1).
    mean = jnp.mean(acc, axis=0, keepdims=True)  # (1, L_out)
    ctr = acc - mean
    var = jnp.mean(ctr * ctr, axis=0, keepdims=True)
    y = ctr * lax.rsqrt(var + eps)
    y = y * g_ref[...] + beta_ref[...]

    # SiLU: y * sigmoid(y)
    y = y * (1.0 / (1.0 + jnp.exp(-y)))

    o_ref[0] = y.astype(o_ref.dtype)


def conv1d_block_forward(x, weight, bias, ln_gamma, ln_beta, *, eps: float = 1e-5):
    """x: (B, Cin, L); weight: (Cout, Cin, k); bias/ln_gamma/ln_beta: (Cout,).

    Returns (B, Cout, L_out) with L_out = L + 2*(k//2) - k + 1 (== L for odd k),
    matching nn.Conv1d(padding=k//2) followed by channel LayerNorm and SiLU.
    """
    B, Cin, L = x.shape
    Cout, Cin_w, k = weight.shape
    assert Cin == Cin_w, "weight in_ch mismatch"
    pad = k // 2
    l_pad = L + 2 * pad
    l_out = l_pad - k + 1

    # Zero-pad the length axis once in the wrapper (cheap XLA op).
    x_pad = jnp.pad(x, ((0, 0), (0, 0), (pad, pad)))
    # Tap-major weight so w_ref[dk] is a (Cout, Cin) matmul operand.
    w_taps = jnp.transpose(weight, (2, 0, 1)).astype(x.dtype)       # (k, Cout, Cin)
    b2 = bias.reshape(Cout, 1).astype(jnp.float32)
    g2 = ln_gamma.reshape(Cout, 1).astype(jnp.float32)
    beta2 = ln_beta.reshape(Cout, 1).astype(jnp.float32)

    kernel = functools.partial(_conv_ln_silu_kernel, k=k, l_out=l_out, eps=eps)

    grid_spec = pltpu.PrefetchScalarGridSpec(
        num_scalar_prefetch=0,
        grid=(B,),
        in_specs=[
            # One padded input row per grid step.
            pl.BlockSpec((1, Cin, l_pad), lambda b: (b, 0, 0)),
            # Parameters: constant index maps -> fetched once, stay resident.
            pl.BlockSpec((k, Cout, Cin), lambda b: (0, 0, 0)),
            pl.BlockSpec((Cout, 1), lambda b: (0, 0)),
            pl.BlockSpec((Cout, 1), lambda b: (0, 0)),
            pl.BlockSpec((Cout, 1), lambda b: (0, 0)),
        ],
        out_specs=pl.BlockSpec((1, Cout, l_out), lambda b: (b, 0, 0)),
    )

    return pl.pallas_call(
        kernel,
        out_shape=jax.ShapeDtypeStruct((B, Cout, l_out), x.dtype),
        grid_spec=grid_spec,
        compiler_params=pltpu.CompilerParams(
            dimension_semantics=("parallel",)),   # megacore split on v7x
    )(x_pad, w_taps, b2, g2, beta2)


def _reference(x, weight, bias, ln_gamma, ln_beta, *, eps: float = 1e-5):
    """Pure-JAX reference of the PyTorch Conv1dBlock forward."""
    k = weight.shape[-1]
    pad = k // 2
    y = lax.conv_general_dilated(
        x, weight, window_strides=(1,), padding=[(pad, pad)],
        dimension_numbers=("NCH", "OIH", "NCH"),
        precision=lax.Precision.HIGHEST)
    y = y + bias[None, :, None]
    yt = jnp.transpose(y, (0, 2, 1))                     # (B, L, Cout)
    mean = jnp.mean(yt, axis=-1, keepdims=True)
    var = jnp.var(yt, axis=-1, keepdims=True)            # biased, like nn.LayerNorm
    yn = (yt - mean) / jnp.sqrt(var + eps)
    yn = yn * ln_gamma + ln_beta
    y = jnp.transpose(yn, (0, 2, 1))                     # (B, Cout, L)
    return y * jax.nn.sigmoid(y)                         # SiLU


if __name__ == "__main__":
    # Small shapes consistent with the module: batch=2, in_ch=4, out_ch=32,
    # spatial length=16, kernel size=3 (padding=1 -> "same" length).
    B, CIN, COUT, L, K = 2, 4, 32, 16, 3

    key = jax.random.PRNGKey(0)
    kx, kw, kb, kg, kbeta = jax.random.split(key, 5)
    x = jax.random.normal(kx, (B, CIN, L), dtype=jnp.float32)
    weight = 0.3 * jax.random.normal(kw, (COUT, CIN, K), dtype=jnp.float32)
    bias = 0.1 * jax.random.normal(kb, (COUT,), dtype=jnp.float32)
    ln_gamma = 1.0 + 0.1 * jax.random.normal(kg, (COUT,), dtype=jnp.float32)
    ln_beta = 0.1 * jax.random.normal(kbeta, (COUT,), dtype=jnp.float32)

    out = conv1d_block_forward(x, weight, bias, ln_gamma, ln_beta)
    out = jax.block_until_ready(out)

    ref = _reference(x, weight, bias, ln_gamma, ln_beta)
    assert out.shape == (B, COUT, L), out.shape
    # Loose-ish tolerance: MXU f32 matmul passes vs XLA conv can differ at the
    # bf16-pass level; a wrong implementation would differ at O(1).
    assert jnp.allclose(out, ref, atol=1e-2, rtol=1e-2), float(
        jnp.max(jnp.abs(out - ref)))

    print("KERNEL_OK")
</pallas_src>

<mosaic_0001>
module attributes {stable_mosaic.version = 11 : i64} {
  func.func @_conv_ln_silu_kernel(%arg0: i32, %arg1: memref<1x4x18xf32, #tpu.memory_space<vmem>>, %arg2: memref<3x32x4xf32, #tpu.memory_space<vmem>>, %arg3: memref<32x1xf32, #tpu.memory_space<vmem>>, %arg4: memref<32x1xf32, #tpu.memory_space<vmem>>, %arg5: memref<32x1xf32, #tpu.memory_space<vmem>>, %arg6: memref<1x32x16xf32, #tpu.memory_space<vmem>>) attributes {dimension_semantics = [#tpu.dimension_semantics<parallel>], iteration_bounds = array<i64: 2>, scalar_prefetch = 0 : i64, scratch_operands = 0 : i64, tpu.core_type = #tpu.core_type<tc>, window_params = [{transform_indices = @transform_0, window_bounds = array<i64: 1, 4, 18>}, {pipeline_mode = #tpu.pipeline_mode<synchronous>, transform_indices = @transform_1, window_bounds = array<i64: 3, 32, 4>}, {pipeline_mode = #tpu.pipeline_mode<synchronous>, transform_indices = @transform_2, window_bounds = array<i64: 32, 1>}, {pipeline_mode = #tpu.pipeline_mode<synchronous>, transform_indices = @transform_3, window_bounds = array<i64: 32, 1>}, {pipeline_mode = #tpu.pipeline_mode<synchronous>, transform_indices = @transform_4, window_bounds = array<i64: 32, 1>}, {transform_indices = @transform_5, window_bounds = array<i64: 1, 32, 16>}]} {
    %c0 = arith.constant 0 : index
    %c0_0 = arith.constant 0 : index
    %c0_1 = arith.constant 0 : index
    %0 = vector.load %arg1[%c0, %c0_0, %c0_1] : memref<1x4x18xf32, #tpu.memory_space<vmem>>, vector<1x4x18xf32>
    %1 = vector.shape_cast %0 : vector<1x4x18xf32> to vector<4x18xf32>
    %c0_2 = arith.constant 0 : index
    %c0_3 = arith.constant 0 : index
    %c0_4 = arith.constant 0 : index
    %2 = vector.load %arg2[%c0_2, %c0_3, %c0_4] : memref<3x32x4xf32, #tpu.memory_space<vmem>>, vector<1x32x4xf32>
    %3 = vector.shape_cast %2 : vector<1x32x4xf32> to vector<32x4xf32>
    %4 = vector.extract_strided_slice %1 {offsets = [0, 0], sizes = [4, 16], strides = [1, 1]} : vector<4x18xf32> to vector<4x16xf32>
    %cst = arith.constant dense<0.000000e+00> : vector<32x16xf32>
    %5 = tpu.matmul %3, %4, %cst {dimension_numbers = #tpu.dot_dimension_numbers<[1], [0], [0], [1], [0, 0, 1, 1], [], []>} : vector<32x4xf32>, vector<4x16xf32>, vector<32x16xf32> -> vector<32x16xf32>
    %c1 = arith.constant 1 : index
    %c0_5 = arith.constant 0 : index
    %c0_6 = arith.constant 0 : index
    %6 = vector.load %arg2[%c1, %c0_5, %c0_6] : memref<3x32x4xf32, #tpu.memory_space<vmem>>, vector<1x32x4xf32>
    %7 = vector.shape_cast %6 : vector<1x32x4xf32> to vector<32x4xf32>
    %8 = vector.extract_strided_slice %1 {offsets = [0, 1], sizes = [4, 16], strides = [1, 1]} : vector<4x18xf32> to vector<4x16xf32>
    %cst_7 = arith.constant dense<0.000000e+00> : vector<32x16xf32>
    %9 = tpu.matmul %7, %8, %cst_7 {dimension_numbers = #tpu.dot_dimension_numbers<[1], [0], [0], [1], [0, 0, 1, 1], [], []>} : vector<32x4xf32>, vector<4x16xf32>, vector<32x16xf32> -> vector<32x16xf32>
    %10 = arith.addf %5, %9 : vector<32x16xf32>
    %c2 = arith.constant 2 : index
    %c0_8 = arith.constant 0 : index
    %c0_9 = arith.constant 0 : index
    %11 = vector.load %arg2[%c2, %c0_8, %c0_9] : memref<3x32x4xf32, #tpu.memory_space<vmem>>, vector<1x32x4xf32>
    %12 = vector.shape_cast %11 : vector<1x32x4xf32> to vector<32x4xf32>
    %13 = vector.extract_strided_slice %1 {offsets = [0, 2], sizes = [4, 16], strides = [1, 1]} : vector<4x18xf32> to vector<4x16xf32>
    %cst_10 = arith.constant dense<0.000000e+00> : vector<32x16xf32>
    %14 = tpu.matmul %12, %13, %cst_10 {dimension_numbers = #tpu.dot_dimension_numbers<[1], [0], [0], [1], [0, 0, 1, 1], [], []>} : vector<32x4xf32>, vector<4x16xf32>, vector<32x16xf32> -> vector<32x16xf32>
    %15 = arith.addf %10, %14 : vector<32x16xf32>
    %c0_11 = arith.constant 0 : index
    %c0_12 = arith.constant 0 : index
    %16 = vector.load %arg3[%c0_11, %c0_12] : memref<32x1xf32, #tpu.memory_space<vmem>>, vector<32x1xf32>
    %17 = vector.broadcast %16 : vector<32x1xf32> to vector<32x16xf32>
    %18 = arith.addf %15, %17 : vector<32x16xf32>
    %cst_13 = arith.constant dense<0.000000e+00> : vector<16xf32>
    %19 = vector.multi_reduction <add>, %18, %cst_13 [0] : vector<32x16xf32> to vector<16xf32>
    %20 = vector.shape_cast %19 : vector<16xf32> to vector<1x16xf32>
    %cst_14 = arith.constant 3.200000e+01 : f32
    %21 = vector.broadcast %cst_14 : f32 to vector<1x16xf32>
    %22 = arith.divf %20, %21 : vector<1x16xf32>
    %23 = vector.broadcast %22 : vector<1x16xf32> to vector<32x16xf32>
    %24 = arith.subf %18, %23 : vector<32x16xf32>
    %25 = arith.mulf %24, %24 : vector<32x16xf32>
    %cst_15 = arith.constant dense<0.000000e+00> : vector<16xf32>
    %26 = vector.multi_reduction <add>, %25, %cst_15 [0] : vector<32x16xf32> to vector<16xf32>
    %27 = vector.shape_cast %26 : vector<16xf32> to vector<1x16xf32>
    %cst_16 = arith.constant 3.200000e+01 : f32
    %28 = vector.broadcast %cst_16 : f32 to vector<1x16xf32>
    %29 = arith.divf %27, %28 : vector<1x16xf32>
    %cst_17 = arith.constant 9.99999974E-6 : f32
    %30 = vector.broadcast %cst_17 : f32 to vector<1x16xf32>
    %31 = arith.addf %29, %30 : vector<1x16xf32>
    %32 = math.rsqrt %31 : vector<1x16xf32>
    %33 = vector.broadcast %32 : vector<1x16xf32> to vector<32x16xf32>
    %34 = arith.mulf %24, %33 : vector<32x16xf32>
    %c0_18 = arith.constant 0 : index
    %c0_19 = arith.constant 0 : index
    %35 = vector.load %arg4[%c0_18, %c0_19] : memref<32x1xf32, #tpu.memory_space<vmem>>, vector<32x1xf32>
    %36 = vector.broadcast %35 : vector<32x1xf32> to vector<32x16xf32>
    %37 = arith.mulf %34, %36 : vector<32x16xf32>
    %c0_20 = arith.constant 0 : index
    %c0_21 = arith.constant 0 : index
    %38 = vector.load %arg5[%c0_20, %c0_21] : memref<32x1xf32, #tpu.memory_space<vmem>>, vector<32x1xf32>
    %39 = vector.broadcast %38 : vector<32x1xf32> to vector<32x16xf32>
    %40 = arith.addf %37, %39 : vector<32x16xf32>
    %cst_22 = arith.constant 0.000000e+00 : f32
    %41 = vector.broadcast %cst_22 : f32 to vector<32x16xf32>
    %42 = arith.subf %41, %40 : vector<32x16xf32>
    %43 = math.exp %42 : vector<32x16xf32>
    %cst_23 = arith.constant 1.000000e+00 : f32
    %44 = vector.broadcast %cst_23 : f32 to vector<32x16xf32>
    %45 = arith.addf %44, %43 : vector<32x16xf32>
    %cst_24 = arith.constant 1.000000e+00 : f32
    %46 = vector.broadcast %cst_24 : f32 to vector<32x16xf32>
    %47 = arith.divf %46, %45 : vector<32x16xf32>
    %48 = arith.mulf %40, %47 : vector<32x16xf32>
    %c0_25 = arith.constant 0 : index
    %c0_26 = arith.constant 0 : index
    %c0_27 = arith.constant 0 : index
    %49 = vector.load %arg6[%c0_25, %c0_26, %c0_27] : memref<1x32x16xf32, #tpu.memory_space<vmem>>, vector<1x32x16xf32>
    %50 = vector.shape_cast %49 : vector<1x32x16xf32> to vector<32x16xf32>
    %51 = vector.shape_cast %48 : vector<32x16xf32> to vector<1x32x16xf32>
    tpu.vector_store %arg6[%c0_25, %c0_26, %c0_27], %51 {strides = array<i32>} : memref<1x32x16xf32, #tpu.memory_space<vmem>>, vector<1x32x16xf32>,
    return
  }
  func.func @transform_0(%arg0: i32) -> (i32, i32, i32) {
    %c0_i32 = arith.constant 0 : i32
    %c0_i32_0 = arith.constant 0 : i32
    %c0_i32_1 = arith.constant 0 : i32
    return %arg0, %c0_i32, %c0_i32_0 : i32, i32, i32
  }
  func.func @transform_1(%arg0: i32) -> (i32, i32, i32) {
    %c0_i32 = arith.constant 0 : i32
    %c0_i32_0 = arith.constant 0 : i32
    %c0_i32_1 = arith.constant 0 : i32
    %c0_i32_2 = arith.constant 0 : i32
    return %c0_i32, %c0_i32_0, %c0_i32_1 : i32, i32, i32
  }
  func.func @transform_2(%arg0: i32) -> (i32, i32) {
    %c0_i32 = arith.constant 0 : i32
    %c0_i32_0 = arith.constant 0 : i32
    %c0_i32_1 = arith.constant 0 : i32
    return %c0_i32, %c0_i32_0 : i32, i32
  }
  func.func @transform_3(%arg0: i32) -> (i32, i32) {
    %c0_i32 = arith.constant 0 : i32
    %c0_i32_0 = arith.constant 0 : i32
    %c0_i32_1 = arith.constant 0 : i32
    return %c0_i32, %c0_i32_0 : i32, i32
  }
  func.func @transform_4(%arg0: i32) -> (i32, i32) {
    %c0_i32 = arith.constant 0 : i32
    %c0_i32_0 = arith.constant 0 : i32
    %c0_i32_1 = arith.constant 0 : i32
    return %c0_i32, %c0_i32_0 : i32, i32
  }
  func.func @transform_5(%arg0: i32) -> (i32, i32, i32) {
    %c0_i32 = arith.constant 0 : i32
    %c0_i32_0 = arith.constant 0 : i32
    %c0_i32_1 = arith.constant 0 : i32
    return %arg0, %c0_i32, %c0_i32_0 : i32, i32, i32
  }
}

</mosaic_0001>

<bundles_post_ra>
// kernel: tpu_custom_call.1
= control target key start
LH: loop header
LB: loop body
LE: loop exit
PB: predicated region body
PF: predicated region fallthrough
CT: control target
= control target key end

     0   :  { %s915_s18 = smov 0   ;;  %s1040_s0 = inlined_call_operand.vmem [shape: f32[2,4,18], index: 0, kind: input, shape index: {}]   ;;  %s1041_s1 = inlined_call_operand.vmem [shape: f32[3,32,4], index: 1, kind: input, shape index: {}]   ;;  %s1042_s2 = inlined_call_operand.vmem [shape: f32[32,1], index: 2, kind: input, shape index: {}]   ;;  %s1043_s3 = inlined_call_operand.vmem [shape: f32[32,1], index: 3, kind: input, shape index: {}]   ;;  %s1044_s4 = inlined_call_operand.vmem [shape: f32[32,1], index: 4, kind: input, shape index: {}]   ;;  %s1045_s5 = inlined_call_operand.vmem [shape: f32[2,32,16], index: 5, kind: output, shape index: {}]  }
   0x1 LB: > { %s760_s19 = sadd.s32 4294967295, %s880_s18   ;;  %p764_p0 = scmp.ge.s32.totalorder %s880_s18, 1  ;;  %s880_s18 = sphi %s915_s18, %s15_s18  }
   0x2   : > { %p186_p1 = scmp.lt.s32.totalorder %s880_s18, 3 }
   0x4   : > { %p187_p2 = pnand %p764_p0, %p186_p1 }
   0x5   : > { %p213_p3 = scmp.lt.s32.totalorder (!%p187_p2), %s760_s19, 1  ;;  %v223_v0 = vld [vmem:[%s1041_s1] sm:$0xff] (!%p187_p2)  ;;  %vm235_vm0 = vcmask (!%p187_p2), 31744   ;;  %vm248_vm1 = vcmask (!%p187_p2), 1043456   ;;  %v224_v3 = vld [vmem:[%s1041_s1 + $0x8] sm:$0xff] (!%p187_p2)  ;;  %s882_s30 = smov (!%p187_p2), 127  }
   0x6   : > { %190 = sbr.rel (%p187_p2) target bundleno = 460 (0x1cc), region = 40  ;;  %819 = vmatprep.mubr.msk.f32.mxu0 (!%p187_p2), %vm235_vm0, %v223_v0  ;;  %v768_v1 = vld [vmem:[%s1041_s1 + $0x20] sm:$0xff] (!%p187_p2)  ;;  %v883_v6 = vmov (!%p187_p2), 0   ;;  %s884_s10 = smov (!%p187_p2), 126   ;;  %v546_v7 = vld [vmem:[%s1042_s2 + $0x8] sm:$0xff] (!%p187_p2)  ;;  %v547_v8 = vld [vmem:[%s1042_s2 + $0x10] sm:$0xff] (!%p187_p2) }
   0x7   : > { %811 = vmatprep.mubr.msk.f32.mxu1 (!%p187_p2), %vm235_vm0, %v768_v1  ;;  %v782_v4 = vld [vmem:[%s1041_s1 + $0x40] sm:$0xff] (!%p187_p2)  ;;  %854 = vset.pattern.permute.xlu1 (!%p187_p2), %v883_v6  ;;  %v548_v9 = vld [vmem:[%s1042_s2 + $0x18] sm:$0xff] (!%p187_p2)  ;;  %v618_v10 = vld [vmem:[%s1043_s3 + $0x8] sm:$0xff] (!%p187_p2)  ;;  %vm573_vm2 = vcmask (!%p187_p2), 130048  }
   0x8   : > { %v545_v5 = vld [vmem:[%s1042_s2] sm:$0xff] (!%p187_p2)  ;;  %855 = vset.pattern.permute.xlu0 (!%p187_p2), %v883_v6  ;;  %v620_v12 = vld [vmem:[%s1043_s3 + $0x18] sm:$0xff] (!%p187_p2)  ;;  %v619_v13 = vld [vmem:[%s1043_s3 + $0x10] sm:$0xff] (!%p187_p2) }
   0x9   : > { %551 = vperm.xlu1 (!%p187_p2), %854, %v545_v5   ;;  %v617_v11 = vld [vmem:[%s1043_s3] sm:$0xff] (!%p187_p2)  ;;  %v646_v14 = vld [vmem:[%s1044_s4 + $0x8] sm:$0xff] (!%p187_p2)  ;;  %v648_v16 = vld [vmem:[%s1044_s4 + $0x18] sm:$0xff] (!%p187_p2) }
   0xa   : > { %v645_v15 = vld [vmem:[%s1044_s4] sm:$0xff] (!%p187_p2)  ;;  %v647_v17 = vld [vmem:[%s1044_s4 + $0x10] sm:$0xff] (!%p187_p2)  ;;  %v769_v19 = vld [vmem:[%s1041_s1 + $0x28] sm:$0xff] (!%p187_p2) }
   0xb   : > { %v770_v20 = vld [vmem:[%s1041_s1 + $0x30] sm:$0xff] (!%p187_p2)  ;;  %v771_v22 = vld [vmem:[%s1041_s1 + $0x38] sm:$0xff] (!%p187_p2)  ;;  %v783_v23 = vld [vmem:[%s1041_s1 + $0x48] sm:$0xff] (!%p187_p2) }
   0xc   : > { %v225_v24 = vld [vmem:[%s1041_s1 + $0x10] sm:$0xff] (!%p187_p2)  ;;  %v785_v26 = vld [vmem:[%s1041_s1 + $0x58] sm:$0xff] (!%p187_p2) }
   0xd   : > { %s1047_s19 = smov (!%p213_p3, %s760_s19), 1  ;;  %556 = vperm.xlu1 %854, %v546_v7   ;;  %v784_v25 = vld [vmem:[%s1041_s1 + $0x50] sm:$0xff]  ;;  %v226_v27 = vld [vmem:[%s1041_s1 + $0x18] sm:$0xff] }
   0xe   : > { %s765_s24 = sshll.u32 %s1047_s19, 2  ;;  %s793_s28 = sshll.u32 %s1047_s19, 5 }
   0xf   : > { %s216_s27 = scalar_lea.vmem %s1040_s0, %s765_s24  ;;  %s221_s6 = scalar_lea.vmem %s1045_s5, %s793_s28 }
  0x10   : > { %v222_v2 = vld [vmem:[%s216_s27] sm:$0xf] }
  0x11   : > { %233 = vrot.lane.b32.xlu0 %v222_v2, %s882_s30  ;;  %817 = vmatprep.subr.msk.mxu0 %vm248_vm1, %v222_v2 }
  0x12   : > { %818 = vmatpush3.msk.msra.mxu0 %vm248_vm1, %v222_v2  ;;  %566 = vperm.xlu1 %854, %v548_v9  }
  0x13   : > { %820 = vmatmul.mubr.msk.f32.vlgmr.msra.gmra.mrb[0].mxu0 %vm235_vm0, %v224_v3 }
  0x14   : > { %827 = vmatprep.mubr.msk.f32.mxu0 %vm235_vm0, %v782_v4 }
  0x15   : > { %440 = vrot.lane.b32.xlu0 %v222_v2, %s884_s10 }
  0x16   : > { %623 = vperm.xlu1 %854, %v617_v11  }
  0x19   : > { %561 = vperm.xlu0 %855, %v547_v8  }
  0x1a   : > { %633 = vperm.xlu1 %854, %v619_v13  }
  0x1d   : > { %628 = vperm.xlu0 %855, %v618_v10  }
  0x1e   : > { %651 = vperm.xlu1 %854, %v645_v15  }
  0x21   : > { %638 = vperm.xlu0 %855, %v620_v12  }
  0x22   : > { %661 = vperm.xlu1 %854, %v647_v17  }
  0x25   : > { %656 = vperm.xlu0 %855, %v646_v14  }
  0x29   : > { %666 = vperm.xlu0 %855, %v648_v16  }
  0x83   : > { %v234_v18 = vpop.permute.xlu0 %233 }
  0x84   : > { %809 = vmatprep.subr.msk.mxu1 %vm248_vm1, %v234_v18 }
  0x85   : > { %810 = vmatpush3.msk.msra.mxu1 %vm248_vm1, %v234_v18 }
  0x86   : > { %812 = vmatmul.mubr.msk.f32.vlgmr.msra.gmra.mrb[0].mxu1 %vm235_vm0, %v769_v19  ;;  %833 = vmatprep.subr.msk.mxu1 %vm248_vm1, %v222_v2 }
  0x87   : > { %v441_v21 = vpop.permute.xlu0 %440  ;;  %814 = vmatprep.mubr.msk.f32.mxu1 %vm235_vm0, %v770_v20  ;;  %834 = vmatpush3.msk.msra.mxu1 %vm248_vm1, %v222_v2 }
  0x88   : > { %825 = vmatprep.subr.msk.mxu0 %vm248_vm1, %v441_v21  ;;  %v552_v28 = vpop.permute.xlu1 %551 }
  0x89   : > { %826 = vmatpush3.msk.msra.mxu0 %vm248_vm1, %v441_v21 }
  0x8a   : > { %815 = vmatmul.mubr.msk.f32.gmra.mrb[2].mxu1 %vm235_vm0, %v771_v22  ;;  %828 = vmatmul.mubr.msk.f32.vlgmr.msra.gmra.mrb[0].mxu0 %vm235_vm0, %v783_v23 }
  0x8b   : > { %822 = vmatprep.mubr.msk.f32.mxu1 %vm235_vm0, %v225_v24  ;;  %830 = vmatprep.mubr.msk.f32.mxu0 %vm235_vm0, %v784_v25 }
  0x8c   : > { %v557_v34 = vpop.permute.xlu1 %556 }
  0x8e   : > { %831 = vmatmul.mubr.msk.f32.gmra.mrb[2].mxu0 %vm235_vm0, %v785_v26 }
  0x91   : > { %v567_v47 = vpop.permute.xlu1 %566 }
  0x92   : > { %823 = vmatmul.mubr.msk.f32.vlgmr.msra.gmra.mrb[2].mxu1 %vm235_vm0, %v226_v27 }
  0x95   : > { %v624_v19 = vpop.permute.xlu1 %623 }
  0x98   : > { %v562_v48 = vpop.permute.xlu0 %561 }
  0x99   : > { %v634_v23 = vpop.permute.xlu1 %633 }
  0x9c   : > { %v629_v20 = vpop.permute.xlu0 %628 }
  0x9d   : > { %v652_v25 = vpop.permute.xlu1 %651 }
  0xa0   : > { %v639_v24 = vpop.permute.xlu0 %638 }
  0xa4   : > { %v657_v26 = vpop.permute.xlu0 %656 }
 0x159   : > { %v813_v29 = vpop.f32.mrb[0].mxu1 }
 0x15a   : > { %v317_v30 = vpop.f32.mrb[1].mxu1 }
 0x15d   : > { %v829_v31 = vpop.f32.mrb[0].mxu0 }
 0x15e   : > { %v835_v32 = vadd.f32 %v829_v31, %v813_v29  ;;  %v522_v33 = vpop.f32.mrb[1].mxu0 }
 0x15f   : > { %v836_v35 = vadd.f32 %v522_v33, %v317_v30 }
 0x160   : > { %v570_v36 = vadd.f32 %v835_v32, %v557_v34 }
 0x161   : > { %v569_v37 = vadd.f32 %v836_v35, %v552_v28  ;;  %v832_v38 = vpop.f32.mrb[2].mxu0 }
 0x162   : > { %v575_v39 = vsel %vm573_vm2, %v570_v36, 0.0  ;;  %v532_v40 = vpop.f32.mrb[3].mxu0 }
 0x163   : > { %v574_v41 = vsel %vm573_vm2, %v569_v37, 0.0 }
 0x164   : > { %v576_v42 = vadd.f32 %v575_v39, %v574_v41 }
 0x165   : > { %v824_v43 = vpop.f32.mrb[2].mxu1 }
 0x166   : > { %v837_v44 = vadd.f32 %v832_v38, %v824_v43  ;;  %v426_v45 = vpop.f32.mrb[3].mxu1 }
 0x167   : > { %v838_v46 = vadd.f32 %v532_v40, %v426_v45 }
 0x168   : > { %v572_v49 = vadd.f32 %v837_v44, %v567_v47 }
 0x169   : > { %v571_v50 = vadd.f32 %v838_v46, %v562_v48 }
 0x16a   : > { %v579_v53 = vsel %vm573_vm2, %v572_v49, 0.0 }
 0x16b   : > { %v577_v51 = vsel %vm573_vm2, %v571_v50, 0.0 }
 0x16c   : > { %v578_v52 = vadd.f32 %v577_v51, %v576_v42 }
 0x16e   : > { %v580_v54 = vadd.f32 %v579_v53, %v578_v52 }
 0x170   : > { %v581_v55 = vrot.slane %v580_v54, 4 }
 0x172   : > { %v582_v56 = vadd.f32 %v581_v55, %v580_v54 }
 0x174   : > { %v583_v57 = vrot.slane %v582_v56, 2 }
 0x176   : > { %v584_v58 = vadd.f32 %v583_v57, %v582_v56 }
 0x178   : > { %v585_v59 = vrot.slane %v584_v58, 1 }
 0x17a   : > { %v586_v60 = vadd.f32 %v585_v59, %v584_v58 }
 0x17c   : > { %v588_v61 = vmul.f32 0.03125, %v586_v60 }
 0x17e   : > { %v589_v62 = vsub.f32 %v569_v37, %v588_v61  ;;  %v590_v63 = vsub.f32 %v570_v36, %v588_v61  ;;  %v591_v0 = vsub.f32 %v571_v50, %v588_v61  ;;  %v592_v1 = vsub.f32 %v572_v49, %v588_v61  ;;  %v662_v36 = vpop.permute.xlu1 %661  ;;  %v667_v37 = vpop.permute.xlu0 %666 }
 0x180   : > { %v593_v2 = vmul.f32 %v589_v62, %v589_v62  ;;  %v594_v3 = vmul.f32 %v590_v63, %v590_v63  ;;  %v595_v4 = vmul.f32 %v591_v0, %v591_v0  ;;  %v596_v5 = vmul.f32 %v592_v1, %v592_v1 }
 0x182   : > { %v597_v6 = vsel %vm573_vm2, %v593_v2, 0.0  ;;  %v598_v7 = vsel %vm573_vm2, %v594_v3, 0.0  ;;  %v600_v9 = vsel %vm573_vm2, %v595_v4, 0.0  ;;  %v602_v11 = vsel %vm573_vm2, %v596_v5, 0.0 }
 0x183   : > { %v599_v8 = vadd.f32 %v598_v7, %v597_v6 }
 0x185   : > { %v601_v10 = vadd.f32 %v600_v9, %v599_v8 }
 0x187   : > { %v603_v12 = vadd.f32 %v602_v11, %v601_v10 }
 0x189   : > { %v604_v13 = vrot.slane %v603_v12, 4 }
 0x18b   : > { %v605_v14 = vadd.f32 %v604_v13, %v603_v12 }
 0x18d   : > { %v606_v15 = vrot.slane %v605_v14, 2 }
 0x18f   : > { %v607_v16 = vadd.f32 %v606_v15, %v605_v14 }
 0x191   : > { %v608_v17 = vrot.slane %v607_v16, 1 }
 0x193   : > { %v609_v18 = vadd.f32 %v608_v17, %v607_v16 }
 0x195   : > { %v610_v21 = vmul.f32 0.03125, %v609_v18 }
 0x197   : > { %v611_v22 = vadd.f32 1e-05, %v610_v21 }
 0x199   : > { %856 = vrsqrt.f32 %v611_v22 }
 0x1a3   : > { %v857_v27 = vpop.eup %856 }
 0x1a4   : > { %v613_v28 = vmul.f32 %v857_v27, %v589_v62  ;;  %v615_v29 = vmul.f32 %v857_v27, %v591_v0  ;;  %v614_v30 = vmul.f32 %v857_v27, %v590_v63  ;;  %v616_v31 = vmul.f32 %v857_v27, %v592_v1 }
 0x1a6   : > { %v641_v32 = vmul.f32 %v624_v19, %v613_v28  ;;  %v643_v33 = vmul.f32 %v634_v23, %v615_v29  ;;  %v642_v34 = vmul.f32 %v629_v20, %v614_v30  ;;  %v644_v35 = vmul.f32 %v639_v24, %v616_v31 }
 0x1a8   : > { %v671_v38 = vadd.f32 %v662_v36, %v643_v33  ;;  %v669_v39 = vadd.f32 %v652_v25, %v641_v32  ;;  %v670_v40 = vadd.f32 %v657_v26, %v642_v34  ;;  %v672_v41 = vadd.f32 %v667_v37, %v644_v35 }
 0x1aa   : > { %v675_v42 = vsub.f32 0.0, %v671_v38  ;;  %v673_v43 = vsub.f32 0.0, %v669_v39  ;;  %v674_v44 = vsub.f32 0.0, %v670_v40  ;;  %v676_v45 = vsub.f32 0.0, %v672_v41 }
 0x1ac   : > { %v681_v46 = vmul.f32 1.442695, %v675_v42  ;;  %v677_v47 = vmul.f32 1.442695, %v673_v43  ;;  %v679_v48 = vmul.f32 1.442695, %v674_v44 }
 0x1ad   : > { %v683_v49 = vmul.f32 1.442695, %v676_v45 }
 0x1ae   : > { %858 = vpow2.f32 %v681_v46 }
 0x1af   : > { %860 = vpow2.f32 %v677_v47 }
 0x1b0   : > { %862 = vpow2.f32 %v679_v48 }
 0x1b1   : > { %864 = vpow2.f32 %v683_v49 }
 0x1b8   : > { %v859_v50 = vpop.eup %858 }
 0x1b9   : > { %v861_v51 = vpop.eup %860  ;;  %v687_v52 = vadd.f32 1.0, %v859_v50 }
 0x1ba   : > { %v863_v53 = vpop.eup %862  ;;  %v685_v54 = vadd.f32 1.0, %v861_v51 }
 0x1bb   : > { %v865_v55 = vpop.eup %864  ;;  %866 = vrcp.f32 %v687_v52  ;;  %v686_v56 = vadd.f32 1.0, %v863_v53 }
 0x1bc   : > { %868 = vrcp.f32 %v685_v54  ;;  %v688_v57 = vadd.f32 1.0, %v865_v55 }
 0x1bd   : > { %870 = vrcp.f32 %v686_v56 }
 0x1be   : > { %872 = vrcp.f32 %v688_v57 }
 0x1c5   : > { %v867_v58 = vpop.eup %866 }
 0x1c6   : > { %v869_v59 = vpop.eup %868  ;;  %v699_v60 = vmul.f32 %v867_v58, %v671_v38 }
 0x1c7   : > { %v871_v61 = vpop.eup %870  ;;  %v697_v62 = vmul.f32 %v869_v59, %v669_v39 }
 0x1c8   : > { %v873_v63 = vpop.eup %872  ;;  %v698_v0 = vmul.f32 %v871_v61, %v670_v40  ;;  %703 = vst.msk [vmem:[%s221_s6 + $0x10] sm:$0xff] %vm573_vm2, %v699_v60 }
 0x1c9   : > { %701 = vst.msk [vmem:[%s221_s6] sm:$0xff] %vm573_vm2, %v697_v62  ;;  %v700_v1 = vmul.f32 %v873_v63, %v672_v41 }
 0x1ca   : > { %702 = vst.msk [vmem:[%s221_s6 + $0x8] sm:$0xff] %vm573_vm2, %v698_v0 }
 0x1cb   : > { %704 = vst.msk [vmem:[%s221_s6 + $0x18] sm:$0xff] %vm573_vm2, %v700_v1 }
 0x1cc PF: > { %s15_s18 = sadd.s32 1, %s880_s18  }
 0x1cd   : > { %p12_p4 = scmp.ge.s32.totalorder %s15_s18, 4  }
 0x1cf   :  { %14 = sbr.rel (!%p12_p4) target bundleno = 1 (0x1), region = 72 }

</bundles_post_ra>
